<compile_context>
chip_gen: v7x
topology: tpu7x:2x2x1
jax: 0.10.0
libtpu: 0.0.40
codegen_flags: <defaults>
</compile_context>

<pallas_src>
import functools

import jax
import jax.numpy as jnp
from jax.experimental import pallas as pl
from jax.experimental.pallas import tpu as pltpu


def _round_up(x, m):
    return ((x + m - 1) // m) * m


def _pad_cols(a, to):
    pad = to - a.shape[1]
    return jnp.pad(a, ((0, 0), (0, pad))) if pad else a


def combiner_kernel(z_ref, gfw_ref, gbw_ref,
                    w_zh_ref, b_zh_ref,
                    w_heads_ref, b_heads_ref,
                    out_ref, *, z_pad):
    # Hoisted one-time bias reads (f32).
    b_zh = b_zh_ref[...]
    b_heads = b_heads_ref[...]

    # g streams arrive as bf16 (half the HBM traffic); upcast for f32 VPU math.
    g_fw = gfw_ref[...].astype(jnp.float32)
    g_bw = gbw_ref[...].astype(jnp.float32)

    # h = tanh(z @ W_zh + b_zh): bf16 MXU operands, f32 accumulation/elementwise.
    h = jnp.tanh(
        jnp.dot(z_ref[...], w_zh_ref[...], preferred_element_type=jnp.float32)
        + b_zh
    )

    # h_combined = (h + g_fw + g_bw) / 3  (all f32 on the VPU; no bf16
    # elementwise -> safe on v5e which has no bf16 VPU/EUP).
    h_comb = (h + g_fw + g_bw) * (1.0 / 3.0)

    # Fused heads: ONE MXU dot producing a lane-dense (tile_b, 2*z_pad) slab
    # whose halves are 128-aligned.
    pre = (
        jnp.dot(h_comb.astype(jnp.bfloat16), w_heads_ref[...],
                preferred_element_type=jnp.float32)
        + b_heads
    )

    # Static, 128-aligned slice writes: loc half is identity, scale half gets
    # softplus (EUP).  No iota/where, softplus not wasted on the loc half.
    out_ref[:, :z_pad] = pre[:, :z_pad]
    out_ref[:, z_pad:] = jax.nn.softplus(pre[:, z_pad:])


def pack_params(p):
    """Fuse the two head linears (each half zero-padded to a 128 multiple) and
    cast matmul weights to bf16 (done once, outside the hot path)."""
    rnn_dim, z_dim = p["w_hl"].shape
    z_pad = _round_up(z_dim, 128)
    w_heads = jnp.concatenate(
        [_pad_cols(p["w_hl"], z_pad), _pad_cols(p["w_hs"], z_pad)], axis=1)
    b_heads = jnp.concatenate(
        [_pad_cols(p["b_hl"], z_pad), _pad_cols(p["b_hs"], z_pad)], axis=1)
    return {
        "w_zh": p["w_zh"].astype(jnp.bfloat16),       # (z, rnn)
        "b_zh": p["b_zh"].astype(jnp.float32),        # (1, rnn)
        "w_heads": w_heads.astype(jnp.bfloat16),      # (rnn, 2*z_pad)
        "b_heads": b_heads.astype(jnp.float32),       # (1, 2*z_pad)
        "z_dim": z_dim,
        "z_pad": z_pad,
    }


def _choose_tile_b(B, tile_b):
    """Batch tile: multiple of 16 (bf16 sublane packing); keep >=2 grid steps
    when the batch allows it so both v7x TensorCores get work."""
    if B <= tile_b:
        if B >= 32:
            half = _round_up(-(-B // 2), 16)
            if half < B:
                return half
        return B                      # single block == full array dim (legal)
    return max(16, (tile_b // 16) * 16)


def _vmem_budget_bytes(tb, z_dim, rnn_dim, z_pad):
    act_in = tb * z_dim * 2 + 2 * tb * rnn_dim * 2          # bf16 activations
    out = tb * 2 * z_pad * 4                                  # f32 output slab
    wts = (z_dim * rnn_dim * 2 + rnn_dim * 4
           + rnn_dim * 2 * z_pad * 2 + 2 * z_pad * 4)         # resident params
    budget = int(2 * (act_in + out + wts) * 1.5) + (4 << 20)  # dbl-buf + slack
    return min(64 << 20, max(16 << 20, budget))               # v7x-safe cap


@functools.partial(jax.jit, static_argnames=("tile_b",))
def combiner_forward(z_t, g_fw_t, g_bw_t, packed, *, tile_b=512):
    """packed: output of pack_params. Returns (loc, scale), each (B, z_dim) f32."""
    B, z_dim = z_t.shape
    rnn_dim = g_fw_t.shape[1]
    z_pad = packed["w_heads"].shape[1] // 2

    tb = _choose_tile_b(B, tile_b)
    grid = (pl.cdiv(B, tb),)          # no jnp.pad: ragged last block is masked

    # All activation streams go over HBM in bf16 (MXU-native / half traffic).
    z_in = z_t.astype(jnp.bfloat16)
    g_fw_in = g_fw_t.astype(jnp.bfloat16)
    g_bw_in = g_bw_t.astype(jnp.bfloat16)

    act_spec = lambda feat: pl.BlockSpec((tb, feat), lambda i: (i, 0))
    resident = lambda shape: pl.BlockSpec(shape, lambda i: (0, 0))

    out = pl.pallas_call(
        functools.partial(combiner_kernel, z_pad=z_pad),
        out_shape=jax.ShapeDtypeStruct((B, 2 * z_pad), jnp.float32),
        grid_spec=pltpu.PrefetchScalarGridSpec(
            num_scalar_prefetch=0,
            grid=grid,
            in_specs=[
                act_spec(z_dim),                      # z_t      (tb, z)     bf16
                act_spec(rnn_dim),                    # g_fw_t   (tb, rnn)   bf16
                act_spec(rnn_dim),                    # g_bw_t   (tb, rnn)   bf16
                resident((z_dim, rnn_dim)),           # w_zh     (resident)
                resident((1, rnn_dim)),               # b_zh     (resident)
                resident((rnn_dim, 2 * z_pad)),       # w_heads  (resident)
                resident((1, 2 * z_pad)),             # b_heads  (resident)
            ],
            out_specs=act_spec(2 * z_pad),            # lane-dense 128-aligned slab
        ),
        compiler_params=pltpu.CompilerParams(
            dimension_semantics=("parallel",),        # shard batch tiles across TCs
            vmem_limit_bytes=_vmem_budget_bytes(tb, z_dim, rnn_dim, z_pad),
        ),
    )(z_in, g_fw_in, g_bw_in,
      packed["w_zh"], packed["b_zh"], packed["w_heads"], packed["b_heads"])

    loc = out[:, :z_dim]
    scale = out[:, z_pad:z_pad + z_dim]
    return loc, scale


def init_params(key, z_dim, rnn_dim):
    ks = jax.random.split(key, 6)

    def u(k, shape, fan_in):
        bound = 1.0 / jnp.sqrt(fan_in)
        return jax.random.uniform(k, shape, jnp.float32, -bound, bound)

    return {
        # stored already transposed: (in_features, out_features)
        "w_zh": u(ks[0], (z_dim, rnn_dim), z_dim),
        "b_zh": u(ks[1], (1, rnn_dim), z_dim),
        "w_hl": u(ks[2], (rnn_dim, z_dim), rnn_dim),
        "b_hl": u(ks[3], (1, z_dim), rnn_dim),
        "w_hs": u(ks[4], (rnn_dim, z_dim), rnn_dim),
        "b_hs": u(ks[5], (1, z_dim), rnn_dim),
    }


def reference_forward_matched(z_t, g_fw_t, g_bw_t, packed):
    """Pure-JAX reference with the SAME bf16 HBM/MXU operands as the kernel."""
    z_dim, z_pad = packed["z_dim"], packed["z_pad"]
    g_fw = g_fw_t.astype(jnp.bfloat16).astype(jnp.float32)
    g_bw = g_bw_t.astype(jnp.bfloat16).astype(jnp.float32)
    h = jnp.tanh(
        jnp.dot(z_t.astype(jnp.bfloat16), packed["w_zh"],
                preferred_element_type=jnp.float32) + packed["b_zh"])
    h_comb = (h + g_fw + g_bw) / 3.0
    pre = jnp.dot(h_comb.astype(jnp.bfloat16), packed["w_heads"],
                  preferred_element_type=jnp.float32) + packed["b_heads"]
    return pre[:, :z_dim], jax.nn.softplus(pre[:, z_pad:z_pad + z_dim])


def reference_forward_f32(z_t, g_fw_t, g_bw_t, params):
    """Full-f32 reference matching the PyTorch module exactly."""
    h = jnp.tanh(z_t @ params["w_zh"] + params["b_zh"])
    h_comb = (h + g_fw_t + g_bw_t) / 3.0
    loc = h_comb @ params["w_hl"] + params["b_hl"]
    scale = jax.nn.softplus(h_comb @ params["w_hs"] + params["b_hs"])
    return loc, scale


# TODO(synk): when this combiner is called per-timestep inside a scan, fold the
# time loop into the kernel (time as an "arbitrary" grid axis with the weights
# on constant index_maps) so weights are DMA'd once per sequence and the launch
# overhead is amortized over T steps.

if __name__ == "__main__":
    B, z_dim, rnn_dim = 60, 32, 64   # B not a tile multiple -> exercises ragged
                                     # (masked) final block, no wrapper padding

    key = jax.random.PRNGKey(0)
    k_z, k_fw, k_bw, k_p = jax.random.split(key, 4)

    z_t = jax.random.normal(k_z, (B, z_dim), jnp.float32)
    g_fw_t = jax.random.normal(k_fw, (B, rnn_dim), jnp.float32)
    g_bw_t = jax.random.normal(k_bw, (B, rnn_dim), jnp.float32)
    params = init_params(k_p, z_dim, rnn_dim)
    packed = pack_params(params)

    loc, scale = combiner_forward(z_t, g_fw_t, g_bw_t, packed)
    jax.block_until_ready((loc, scale))

    # Tight check against a reference with the same bf16 HBM/MXU operands.
    loc_m, scale_m = reference_forward_matched(z_t, g_fw_t, g_bw_t, packed)
    assert loc.shape == (B, z_dim) and scale.shape == (B, z_dim)
    assert jnp.allclose(loc, loc_m, atol=5e-3, rtol=5e-3)
    assert jnp.allclose(scale, scale_m, atol=5e-3, rtol=5e-3)

    # Loose check against the exact f32 PyTorch semantics.
    loc_f, scale_f = reference_forward_f32(z_t, g_fw_t, g_bw_t, params)
    assert jnp.allclose(loc, loc_f, atol=5e-2, rtol=5e-2)
    assert jnp.allclose(scale, scale_f, atol=5e-2, rtol=5e-2)
    assert bool(jnp.all(scale > 0.0))

    print("KERNEL_OK")
</pallas_src>

<mosaic_0001>
module attributes {stable_mosaic.version = 11 : i64} {
  func.func @combiner_kernel(%arg0: i32, %arg1: memref<32x32xbf16, #tpu.memory_space<vmem>>, %arg2: memref<32x64xbf16, #tpu.memory_space<vmem>>, %arg3: memref<32x64xbf16, #tpu.memory_space<vmem>>, %arg4: memref<32x64xbf16, #tpu.memory_space<vmem>>, %arg5: memref<1x64xf32, #tpu.memory_space<vmem>>, %arg6: memref<64x256xbf16, #tpu.memory_space<vmem>>, %arg7: memref<1x256xf32, #tpu.memory_space<vmem>>, %arg8: memref<32x256xf32, #tpu.memory_space<vmem>>) attributes {dimension_semantics = [#tpu.dimension_semantics<parallel>], iteration_bounds = array<i64: 2>, scalar_prefetch = 0 : i64, scratch_operands = 0 : i64, tpu.core_type = #tpu.core_type<tc>, window_params = [{transform_indices = @transform_0, window_bounds = array<i64: 32, 32>}, {transform_indices = @transform_1, window_bounds = array<i64: 32, 64>}, {transform_indices = @transform_2, window_bounds = array<i64: 32, 64>}, {pipeline_mode = #tpu.pipeline_mode<synchronous>, transform_indices = @transform_3, window_bounds = array<i64: 32, 64>}, {pipeline_mode = #tpu.pipeline_mode<synchronous>, transform_indices = @transform_4, window_bounds = array<i64: 1, 64>}, {pipeline_mode = #tpu.pipeline_mode<synchronous>, transform_indices = @transform_5, window_bounds = array<i64: 64, 256>}, {pipeline_mode = #tpu.pipeline_mode<synchronous>, transform_indices = @transform_6, window_bounds = array<i64: 1, 256>}, {transform_indices = @transform_7, window_bounds = array<i64: 32, 256>}]} {
    %c0 = arith.constant 0 : index
    %c0_0 = arith.constant 0 : index
    %0 = vector.load %arg5[%c0, %c0_0] : memref<1x64xf32, #tpu.memory_space<vmem>>, vector<1x64xf32>
    %c0_1 = arith.constant 0 : index
    %c0_2 = arith.constant 0 : index
    %1 = vector.load %arg7[%c0_1, %c0_2] : memref<1x256xf32, #tpu.memory_space<vmem>>, vector<1x256xf32>
    %c0_3 = arith.constant 0 : index
    %c0_4 = arith.constant 0 : index
    %2 = vector.load %arg2[%c0_3, %c0_4] : memref<32x64xbf16, #tpu.memory_space<vmem>>, vector<32x64xbf16>
    %3 = arith.extf %2 : vector<32x64xbf16> to vector<32x64xf32>
    %c0_5 = arith.constant 0 : index
    %c0_6 = arith.constant 0 : index
    %4 = vector.load %arg3[%c0_5, %c0_6] : memref<32x64xbf16, #tpu.memory_space<vmem>>, vector<32x64xbf16>
    %5 = arith.extf %4 : vector<32x64xbf16> to vector<32x64xf32>
    %c0_7 = arith.constant 0 : index
    %c0_8 = arith.constant 0 : index
    %6 = vector.load %arg1[%c0_7, %c0_8] : memref<32x32xbf16, #tpu.memory_space<vmem>>, vector<32x32xbf16>
    %c0_9 = arith.constant 0 : index
    %c0_10 = arith.constant 0 : index
    %7 = vector.load %arg4[%c0_9, %c0_10] : memref<32x64xbf16, #tpu.memory_space<vmem>>, vector<32x64xbf16>
    %cst = arith.constant dense<0.000000e+00> : vector<32x64xf32>
    %8 = tpu.matmul %6, %7, %cst {dimension_numbers = #tpu.dot_dimension_numbers<[1], [0], [0], [1], [0, 0, 1, 1], [], []>} : vector<32x32xbf16>, vector<32x64xbf16>, vector<32x64xf32> -> vector<32x64xf32>
    %9 = vector.broadcast %0 : vector<1x64xf32> to vector<32x64xf32>
    %10 = arith.addf %8, %9 : vector<32x64xf32>
    %11 = math.tanh %10 : vector<32x64xf32>
    %12 = arith.addf %11, %3 : vector<32x64xf32>
    %13 = arith.addf %12, %5 : vector<32x64xf32>
    %cst_11 = arith.constant 0.333333343 : f32
    %14 = vector.broadcast %cst_11 : f32 to vector<32x64xf32>
    %15 = arith.mulf %13, %14 : vector<32x64xf32>
    %16 = arith.truncf %15 : vector<32x64xf32> to vector<32x64xbf16>
    %c0_12 = arith.constant 0 : index
    %c0_13 = arith.constant 0 : index
    %17 = vector.load %arg6[%c0_12, %c0_13] : memref<64x256xbf16, #tpu.memory_space<vmem>>, vector<64x256xbf16>
    %cst_14 = arith.constant dense<0.000000e+00> : vector<32x256xf32>
    %18 = tpu.matmul %16, %17, %cst_14 {dimension_numbers = #tpu.dot_dimension_numbers<[1], [0], [0], [1], [0, 0, 1, 1], [], []>} : vector<32x64xbf16>, vector<64x256xbf16>, vector<32x256xf32> -> vector<32x256xf32>
    %19 = vector.broadcast %1 : vector<1x256xf32> to vector<32x256xf32>
    %20 = arith.addf %18, %19 : vector<32x256xf32>
    %21 = vector.extract_strided_slice %20 {offsets = [0, 0], sizes = [32, 128], strides = [1, 1]} : vector<32x256xf32> to vector<32x128xf32>
    %c0_15 = arith.constant 0 : index
    %c0_16 = arith.constant 0 : index
    %22 = vector.load %arg8[%c0_15, %c0_16] : memref<32x256xf32, #tpu.memory_space<vmem>>, vector<32x128xf32>
    tpu.vector_store %arg8[%c0_15, %c0_16], %21 {strides = array<i32>} : memref<32x256xf32, #tpu.memory_space<vmem>>, vector<32x128xf32>,
    %23 = vector.extract_strided_slice %20 {offsets = [0, 128], sizes = [32, 128], strides = [1, 1]} : vector<32x256xf32> to vector<32x128xf32>
    %cst_17 = arith.constant 0.000000e+00 : f32
    %24 = vector.broadcast %cst_17 : f32 to vector<32x128xf32>
    %25 = arith.maximumf %23, %24 : vector<32x128xf32>
    %26 = vector.broadcast %cst_17 : f32 to vector<32x128xf32>
    %27 = arith.subf %23, %26 : vector<32x128xf32>
    %28 = arith.cmpf one, %27, %27 : vector<32x128xf32>
    %29 = vector.broadcast %cst_17 : f32 to vector<32x128xf32>
    %30 = arith.addf %23, %29 : vector<32x128xf32>
    %31 = math.absf %27 : vector<32x128xf32>
    %cst_18 = arith.constant 0.000000e+00 : f32
    %32 = vector.broadcast %cst_18 : f32 to vector<32x128xf32>
    %33 = arith.subf %32, %31 : vector<32x128xf32>
    %34 = math.exp %33 : vector<32x128xf32>
    %35 = math.log1p %34 : vector<32x128xf32>
    %36 = arith.addf %25, %35 : vector<32x128xf32>
    %37 = arith.select %28, %30, %36 : vector<32x128xi1>, vector<32x128xf32>
    %c0_19 = arith.constant 0 : index
    %c128 = arith.constant 128 : index
    %38 = vector.load %arg8[%c0_19, %c128] : memref<32x256xf32, #tpu.memory_space<vmem>>, vector<32x128xf32>
    tpu.vector_store %arg8[%c0_19, %c128], %37 {strides = array<i32>} : memref<32x256xf32, #tpu.memory_space<vmem>>, vector<32x128xf32>,
    return
  }
  func.func @transform_0(%arg0: i32) -> (i32, i32) {
    %c0_i32 = arith.constant 0 : i32
    %c0_i32_0 = arith.constant 0 : i32
    return %arg0, %c0_i32 : i32, i32
  }
  func.func @transform_1(%arg0: i32) -> (i32, i32) {
    %c0_i32 = arith.constant 0 : i32
    %c0_i32_0 = arith.constant 0 : i32
    return %arg0, %c0_i32 : i32, i32
  }
  func.func @transform_2(%arg0: i32) -> (i32, i32) {
    %c0_i32 = arith.constant 0 : i32
    %c0_i32_0 = arith.constant 0 : i32
    return %arg0, %c0_i32 : i32, i32
  }
  func.func @transform_3(%arg0: i32) -> (i32, i32) {
    %c0_i32 = arith.constant 0 : i32
    %c0_i32_0 = arith.constant 0 : i32
    %c0_i32_1 = arith.constant 0 : i32
    return %c0_i32, %c0_i32_0 : i32, i32
  }
  func.func @transform_4(%arg0: i32) -> (i32, i32) {
    %c0_i32 = arith.constant 0 : i32
    %c0_i32_0 = arith.constant 0 : i32
    %c0_i32_1 = arith.constant 0 : i32
    return %c0_i32, %c0_i32_0 : i32, i32
  }
  func.func @transform_5(%arg0: i32) -> (i32, i32) {
    %c0_i32 = arith.constant 0 : i32
    %c0_i32_0 = arith.constant 0 : i32
    %c0_i32_1 = arith.constant 0 : i32
    return %c0_i32, %c0_i32_0 : i32, i32
  }
  func.func @transform_6(%arg0: i32) -> (i32, i32) {
    %c0_i32 = arith.constant 0 : i32
    %c0_i32_0 = arith.constant 0 : i32
    %c0_i32_1 = arith.constant 0 : i32
    return %c0_i32, %c0_i32_0 : i32, i32
  }
  func.func @transform_7(%arg0: i32) -> (i32, i32) {
    %c0_i32 = arith.constant 0 : i32
    %c0_i32_0 = arith.constant 0 : i32
    return %arg0, %c0_i32 : i32, i32
  }
}

</mosaic_0001>

<bundles_post_ra>
// kernel: combiner_forward.1
= control target key start
LH: loop header
LB: loop body
LE: loop exit
PB: predicated region body
PF: predicated region fallthrough
CT: control target
= control target key end

     0   :  { %s900_s24 = smov 0   ;;  %s1006_s0 = inlined_call_operand.vmem [shape: bf16[60,32], index: 0, kind: input, shape index: {}]   ;;  %s1007_s1 = inlined_call_operand.vmem [shape: bf16[60,64], index: 1, kind: input, shape index: {}]   ;;  %s1008_s2 = inlined_call_operand.vmem [shape: bf16[60,64], index: 2, kind: input, shape index: {}]   ;;  %s1009_s3 = inlined_call_operand.vmem [shape: bf16[32,64], index: 3, kind: input, shape index: {}]   ;;  %s1010_s4 = inlined_call_operand.vmem [shape: f32[1,64], index: 4, kind: input, shape index: {}]   ;;  %s1011_s5 = inlined_call_operand.vmem [shape: bf16[64,256], index: 5, kind: input, shape index: {}]   ;;  %s1012_s6 = inlined_call_operand.vmem [shape: f32[1,256], index: 6, kind: input, shape index: {}]   ;;  %s1013_s7 = inlined_call_operand.vmem [shape: f32[60,256], index: 7, kind: output, shape index: {}]  }
   0x1 LB: > { %s738_s25 = sadd.s32 4294967295, %s857_s24   ;;  %p742_p0 = scmp.ge.s32.totalorder %s857_s24, 1  ;;  %s857_s24 = sphi %s900_s24, %s17_s24  }
   0x2   : > { %p260_p1 = scmp.lt.s32.totalorder %s857_s24, 3 }
   0x4   : > { %p261_p2 = pnand %p742_p0, %p260_p1 }
   0x5   : > { %v811_v0 = vld [vmem:[%s1009_s3] sm:$0xff] (!%p261_p2)   ;;  %s743_s28 = sshll.u32 (!%p261_p2), %s738_s25, 2  ;;  %v812_v1 = vld [vmem:[%s1009_s3 + $0x8] sm:$0xff] (!%p261_p2)   ;;  %vm383_vm0 = vcmask (!%p261_p2), 261120   ;;  %v818_v6 = vld [vmem:[%s1011_s5 + $0x14] ss:$8 sps:$4 sm:$0xff] (!%p261_p2)   ;;  %v466_v52 = vlaneseq (!%p261_p2) }
   0x6   : > { %264 = sbr.rel (%p261_p2) target bundleno = 516 (0x204), region = 48  ;;  %p304_p3 = scmp.lt.s32.totalorder (!%p261_p2), %s743_s28, 7  ;;  %794 = vmatprep.subr.bf16.mxu0 (!%p261_p2), %v811_v0  ;;  %v815_v4 = vld [vmem:[%s1011_s5 + $0x4] ss:$8 sps:$4 sm:$0xff] (!%p261_p2)   ;;  %v817_v5 = vld [vmem:[%s1011_s5] ss:$8 sps:$4 sm:$0xff] (!%p261_p2)  }
   0x7   : > { %795 = vmatpush3.bf16.msra.mxu0 (!%p261_p2), %v811_v0  ;;  %523 = vmatprep.subr.bf16.mxu1 (!%p261_p2), %v815_v4  ;;  %v820_v7 = vld [vmem:[%s1011_s5 + $0x10] ss:$8 sps:$4 sm:$0xff] (!%p261_p2)   ;;  %v859_v8 = vmov (!%p261_p2), 0   ;;  %v821_v9 = vld [vmem:[%s1011_s5 + $0x24] ss:$8 sps:$4 sm:$0xff] (!%p261_p2)   ;;  %vm516_vm1 = vcmask (!%p261_p2), 523264  }
   0x8   : > { %796 = vmatprep.subr.bf16.mxu0 (!%p261_p2), %v812_v1  ;;  %524 = vmatpush1.bf16.msra.mxu1 (!%p261_p2), %v817_v5  ;;  %v823_v10 = vld [vmem:[%s1011_s5 + $0x20] ss:$8 sps:$4 sm:$0xff] (!%p261_p2)   ;;  %v824_v11 = vld [vmem:[%s1011_s5 + $0x34] ss:$8 sps:$4 sm:$0xff] (!%p261_p2)   ;;  %v826_v12 = vld [vmem:[%s1011_s5 + $0x30] ss:$8 sps:$4 sm:$0xff] (!%p261_p2)  }
   0x9   : > { %555 = vmatprep.mubr.bf16.mxu1 (!%p261_p2), %v859_v8  ;;  %525 = vmatprep.subr.bf16.mxu1 (!%p261_p2), %v818_v6  ;;  %v752_v13 = vld [vmem:[%s1010_s4] ss:$0 sm:$0xff] (!%p261_p2)  ;;  %v467_v53 = vshrl.u32 (!%p261_p2), %v466_v52, 7 }
   0xa   : > { %v330_v55 = vld [vmem:[%s1012_s6] sm:$0x3] (!%p261_p2) }
   0xb   : > { %797 = vmatpush3.bf16.msra.mxu0 (!%p261_p2), %v812_v1  ;;  %v468_v54 = vsub.s32 (!%p261_p2), 0, %v467_v53  ;;  %v472_v56 = vsub.s32 (!%p261_p2), 1, %v467_v53 }
   0xc   : > { %526 = vmatpush1.bf16.msra.mxu1 (!%p261_p2), %v820_v7 }
   0xd   : > { %s1015_s28 = smov (!%p304_p3, %s743_s28), 7  ;;  %527 = vmatprep.subr.bf16.mxu1 %v821_v9  ;;  %v469_v57 = vrot.slane %v330_v55, %v468_v54  ;;  %v473_v58 = vrot.slane %v330_v55, %v472_v56 }
   0xe   : > { %s917_s8 = sshll.u32 %s1015_s28, 2  ;;  %s771_s17 = sshll.u32 %s1015_s28, 4 }
   0xf   : > { %s307_s11 = scalar_lea.vmem %s1006_s0, %s917_s8  ;;  %s313_s12 = scalar_lea.vmem %s1007_s1, %s917_s8 }
  0x10   : > { %v813_v2 = vld [vmem:[%s307_s11] sm:$0xff]   ;;  %v814_v3 = vld [vmem:[%s307_s11 + $0x8] sm:$0xff]   ;;  %528 = vmatpush1.bf16.msra.mxu1 %v823_v10  ;;  %s319_s15 = scalar_lea.vmem %s1008_s2, %s917_s8  ;;  %s965_s20 = scalar_lea.vmem %s1013_s7, %s771_s17 }
  0x11   : > { %798 = vmatprep.mubr.msk.bf16.mxu0 %vm383_vm0, %v813_v2  ;;  %529 = vmatprep.subr.bf16.mxu1 %v824_v11  ;;  %v788_v22 = vld [vmem:[%s313_s12 + $0x8] sm:$0xff]   ;;  %v773_v23 = vld [vmem:[%s313_s12] sm:$0xff]  }
  0x12   : > { %799 = vmatmul.mubr.msk.bf16.vlgmr.msra.gmra.mrb[0].mxu0 %vm383_vm0, %v814_v3  ;;  %v789_v24 = vld [vmem:[%s319_s15 + $0x8] sm:$0xff]   ;;  %v778_v25 = vunpack.c.l.bf16 %v788_v22  ;;  %v781_v26 = vld [vmem:[%s319_s15] sm:$0xff]   ;;  %v774_v27 = vunpack.c.l.bf16 %v773_v23  ;;  %v779_v28 = vunpack.c.h.bf16 %v788_v22  ;;  %v775_v31 = vunpack.c.h.bf16 %v773_v23 }
  0x13   : > { %v786_v29 = vunpack.c.l.bf16 %v789_v24  ;;  %v782_v32 = vunpack.c.l.bf16 %v781_v26  ;;  %v787_v34 = vunpack.c.h.bf16 %v789_v24  ;;  %v783_v37 = vunpack.c.h.bf16 %v781_v26 }
  0x14   : > { %530 = vmatpush1.bf16.msra.mxu1 %v826_v12 }
  0xe5   : > { %v800_v14 = vpop.f32.mrb[0].mxu0 }
  0xe6   : > { %v433_v15 = vadd.f32 %v800_v14, %v752_v13  ;;  %v424_v16 = vpop.f32.mrb[1].mxu0 }
  0xe7   : > { %v425_v17 = vadd.f32 %v752_v13, %v424_v16  ;;  %v801_v18 = vpop.f32.mrb[2].mxu0 }
  0xe8   : > { %827 = vtanh.f32 %v433_v15  ;;  %v436_v19 = vadd.f32 %v801_v18, %v752_v13  ;;  %v427_v20 = vpop.f32.mrb[3].mxu0 }
  0xe9   : > { %829 = vtanh.f32 %v425_v17  ;;  %v428_v21 = vadd.f32 %v752_v13, %v427_v20 }
  0xea   : > { %831 = vtanh.f32 %v436_v19 }
  0xeb   : > { %833 = vtanh.f32 %v428_v21 }
  0xf2   : > { %v828_v30 = vpop.eup %827 }
  0xf3   : > { %v830_v33 = vpop.eup %829  ;;  %v445_v35 = vadd.f32 %v828_v30, %v778_v25 }
  0xf4   : > { %v832_v36 = vpop.eup %831  ;;  %v443_v38 = vadd.f32 %v830_v33, %v774_v27 }
  0xf5   : > { %v834_v39 = vpop.eup %833  ;;  %v446_v40 = vadd.f32 %v832_v36, %v779_v28  ;;  %v449_v41 = vadd.f32 %v786_v29, %v445_v35 }
  0xf6   : > { %v444_v42 = vadd.f32 %v834_v39, %v775_v31  ;;  %v447_v43 = vadd.f32 %v782_v32, %v443_v38 }
  0xf7   : > { %v450_v44 = vadd.f32 %v787_v34, %v446_v40  ;;  %v453_v46 = vmul.f32 0.33333334, %v449_v41 }
  0xf8   : > { %v448_v45 = vadd.f32 %v783_v37, %v444_v42  ;;  %v451_v48 = vmul.f32 0.33333334, %v447_v43 }
  0xf9   : > { %v454_v47 = vmul.f32 0.33333334, %v450_v44 }
  0xfa   : > { %v452_v49 = vmul.f32 0.33333334, %v448_v45 }
  0xfb   : > { %v456_v50 = vpack.c.bf16 %v454_v47, %v453_v46 }
  0xfc   : > { %v455_v51 = vpack.c.bf16 %v452_v49, %v451_v48 }
  0xfe   : > { %767 = vmatmul.mubr.msk.bf16.vlgmr.msra.gmra.mrb[0].mxu1 %vm516_vm1, %v455_v51 }
  0xff   : > { %565 = vmatprep.mubr.bf16.mxu1 %v859_v8 }
 0x106   : > { %768 = vmatmul.mubr.msk.bf16.gmra.mrb[4].mxu1 %vm516_vm1, %v456_v50 }
 0x1d1   : > { %v557_v59 = vpop.f32.mrb[0].mxu1 }
 0x1d2   : > { %v558_v60 = vadd.f32 %v557_v59, %v469_v57  ;;  %v559_v61 = vpop.f32.mrb[1].mxu1 }
 0x1d3   : > { %v967_v62 = vadd.f32 %v559_v61, %v473_v58  ;;  %v561_v63 = vpop.f32.mrb[2].mxu1 }
 0x1d4   : > { %576 = vst [vmem:[%s965_s20] sm:$0xff] %v558_v60  ;;  %v562_v0 = vadd.f32 %v561_v63, %v469_v57  ;;  %v563_v1 = vpop.f32.mrb[3].mxu1 }
 0x1d5   : > { %v592_v2 = vand.u32 2147483647, %v967_v62  ;;  %v971_v3 = vadd.f32 %v563_v1, %v473_v58  ;;  %v580_v42 = vmax.f32 %v967_v62, 0.0  ;;  %vm584_vm4 = vcmp.ne.f32.partialorder %v967_v62, %v967_v62 }
 0x1d6   : > { %577 = vst [vmem:[%s965_s20 + $0x10] sm:$0xff] %v562_v0 }
 0x1d7   : > { %v596_v4 = vsub.f32 0.0, %v592_v2  ;;  %v593_v5 = vand.u32 2147483647, %v971_v3  ;;  %v581_v47 = vmax.f32 %v971_v3, 0.0  ;;  %vm585_vm5 = vcmp.ne.f32.partialorder %v971_v3, %v971_v3 }
 0x1d9   : > { %v600_v6 = vmul.f32 1.442695, %v596_v4  ;;  %v597_v7 = vsub.f32 0.0, %v593_v5  ;;  %v567_v8 = vpop.f32.mrb[4].mxu1 }
 0x1da   : > { %v568_v9 = vadd.f32 %v567_v8, %v469_v57  ;;  %v569_v10 = vpop.f32.mrb[5].mxu1 }
 0x1db   : > { %835 = vpow2.f32 %v600_v6  ;;  %v602_v11 = vmul.f32 1.442695, %v597_v7  ;;  %v975_v12 = vadd.f32 %v569_v10, %v473_v58  ;;  %v571_v13 = vpop.f32.mrb[6].mxu1 }
 0x1dc   : > { %578 = vst [vmem:[%s965_s20 + $0x20] sm:$0xff] %v568_v9  ;;  %v572_v14 = vadd.f32 %v571_v13, %v469_v57  ;;  %v573_v15 = vpop.f32.mrb[7].mxu1 }
 0x1dd   : > { %837 = vpow2.f32 %v602_v11  ;;  %v594_v16 = vand.u32 2147483647, %v975_v12  ;;  %v980_v17 = vadd.f32 %v573_v15, %v473_v58  ;;  %v582_v60 = vmax.f32 %v975_v12, 0.0 }
 0x1de   : > { %579 = vst [vmem:[%s965_s20 + $0x30] sm:$0xff] %v572_v14  ;;  %vm586_vm7 = vcmp.ne.f32.partialorder %v975_v12, %v975_v12 }
 0x1df   : > { %v598_v18 = vsub.f32 0.0, %v594_v16  ;;  %v595_v19 = vand.u32 2147483647, %v980_v17  ;;  %v583_v2 = vmax.f32 %v980_v17, 0.0  ;;  %vm587_vm9 = vcmp.ne.f32.partialorder %v980_v17, %v980_v17 }
 0x1e1   : > { %v604_v20 = vmul.f32 1.442695, %v598_v18  ;;  %v599_v21 = vsub.f32 0.0, %v595_v19 }
 0x1e3   : > { %839 = vpow2.f32 %v604_v20  ;;  %v606_v22 = vmul.f32 1.442695, %v599_v21 }
 0x1e5   : > { %v836_v23 = vpop.eup %835  ;;  %841 = vpow2.f32 %v606_v22 }
 0x1e6   : > { %v608_v24 = vadd.f32 1.0, %v836_v23  ;;  %v611_v27 = vmul.f32 -0.5, %v836_v23  ;;  %v614_v33 = vand.u32 2147483647, %v836_v23 }
 0x1e7   : > { %v838_v25 = vpop.eup %837 }
 0x1e8   : > { %843 = vlog2.f32 %v608_v24  ;;  %v617_v26 = vadd.f32 1.0, %v838_v25  ;;  %v620_v29 = vmul.f32 -0.5, %v838_v25  ;;  %v612_v31 = vadd.f32 1.0, %v611_v27 }
 0x1e9   : > { %v623_v37 = vand.u32 2147483647, %v838_v25  ;;  %vm615_vm2 = vcmp.lt.f32.partialorder %v614_v33, 0.0004427343 }
 0x1ea   : > { %845 = vlog2.f32 %v617_v26  ;;  %v621_v34 = vadd.f32 1.0, %v620_v29  ;;  %v613_v39 = vmul.f32 %v836_v23, %v612_v31 }
 0x1eb   : > { %vm624_vm3 = vcmp.lt.f32.partialorder %v623_v37, 0.0004427343 }
 0x1ec   : > { %v622_v45 = vmul.f32 %v838_v25, %v621_v34 }
 0x1ed   : > { %v840_v28 = vpop.eup %839 }
 0x1ee   : > { %v626_v30 = vadd.f32 1.0, %v840_v28  ;;  %v629_v40 = vmul.f32 -0.5, %v840_v28  ;;  %v632_v53 = vand.u32 2147483647, %v840_v28 }
 0x1ef   : > { %v842_v32 = vpop.eup %841 }
 0x1f0   : > { %847 = vlog2.f32 %v626_v30  ;;  %v635_v35 = vadd.f32 1.0, %v842_v32  ;;  %v638_v48 = vmul.f32 -0.5, %v842_v32  ;;  %v630_v50 = vadd.f32 1.0, %v629_v40 }
 0x1f1   : > { %v641_v59 = vand.u32 2147483647, %v842_v32  ;;  %vm633_vm6 = vcmp.lt.f32.partialorder %v632_v53, 0.0004427343 }
 0x1f2   : > { %v844_v36 = vpop.eup %843  ;;  %849 = vlog2.f32 %v635_v35  ;;  %v639_v56 = vadd.f32 1.0, %v638_v48  ;;  %v631_v58 = vmul.f32 %v840_v28, %v630_v50 }
 0x1f3   : > { %v610_v38 = vmul.f32 0.6931472, %v844_v36  ;;  %vm642_vm8 = vcmp.lt.f32.partialorder %v641_v59, 0.0004427343 }
 0x1f4   : > { %v846_v41 = vpop.eup %845  ;;  %v640_v1 = vmul.f32 %v842_v32, %v639_v56 }
 0x1f5   : > { %v616_v43 = vsel %vm615_vm2, %v613_v39, %v610_v38  ;;  %v619_v44 = vmul.f32 0.6931472, %v846_v41 }
 0x1f6   : > { %v644_v46 = vadd.f32 %v616_v43, %v580_v42 }
 0x1f7   : > { %v625_v49 = vsel %vm624_vm3, %v622_v45, %v619_v44 }
 0x1f8   : > { %v648_v51 = vsel %vm584_vm4, %v967_v62, %v644_v46  ;;  %v645_v52 = vadd.f32 %v625_v49, %v581_v47 }
 0x1f9   : > { %652 = vst [vmem:[%s965_s20 + $0x8] sm:$0xff] %v648_v51 }
 0x1fa   : > { %v848_v54 = vpop.eup %847  ;;  %v649_v55 = vsel %vm585_vm5, %v971_v3, %v645_v52 }
 0x1fb   : > { %653 = vst [vmem:[%s965_s20 + $0x18] sm:$0xff] %v649_v55  ;;  %v628_v57 = vmul.f32 0.6931472, %v848_v54 }
 0x1fc   : > { %v850_v61 = vpop.eup %849 }
 0x1fd   : > { %v634_v62 = vsel %vm633_vm6, %v631_v58, %v628_v57  ;;  %v637_v0 = vmul.f32 0.6931472, %v850_v61 }
 0x1fe   : > { %v646_v63 = vadd.f32 %v634_v62, %v582_v60 }
 0x1ff   : > { %v643_v4 = vsel %vm642_vm8, %v640_v1, %v637_v0 }
 0x200   : > { %v650_v3 = vsel %vm586_vm7, %v975_v12, %v646_v63  ;;  %v647_v5 = vadd.f32 %v643_v4, %v583_v2 }
 0x201   : > { %654 = vst [vmem:[%s965_s20 + $0x28] sm:$0xff] %v650_v3 }
 0x202   : > { %v651_v6 = vsel %vm587_vm9, %v980_v17, %v647_v5 }
 0x203   : > { %655 = vst [vmem:[%s965_s20 + $0x38] sm:$0xff] %v651_v6 }
 0x204 PF: > { %s17_s24 = sadd.s32 1, %s857_s24  }
 0x205   : > { %p14_p4 = scmp.ge.s32.totalorder %s17_s24, 4  }
 0x207   :  { %16 = sbr.rel (!%p14_p4) target bundleno = 1 (0x1), region = 84 }

</bundles_post_ra>
